<compile_context>
chip_gen: v7x
topology: tpu7x:2x2x1
jax: 0.10.0
libtpu: 0.0.40
codegen_flags: <defaults>
</compile_context>

<pallas_src>
import functools
import math

import jax
import jax.numpy as jnp
from jax import lax
from jax.experimental import pallas as pl
from jax.experimental.pallas import tpu as pltpu


def _round_up(x, m):
    return ((x + m - 1) // m) * m


def _sublane_multiple(dtype):
    # Native sublane packing: 8 rows for 32-bit, 16 for 16-bit, 32 for 8-bit.
    itemsize = jnp.dtype(dtype).itemsize
    return max(8, 32 // itemsize)


def _pick_tile(dim, pref, align):
    """Return (tile, padded_dim).

    If the dim fits in one preferred block, use the full dim (allowed by the
    "block equals full array dim" exception) -> no padding, no extra HBM pass.
    Otherwise tile with an alignment-friendly size and pad up to a multiple.
    """
    if dim <= pref:
        return dim, dim
    tile = max(align, (pref // align) * align)
    return tile, _round_up(dim, tile)


def _linear_kernel_f32(x_ref, w_ref, b_ref, o_ref):
    # x_ref: (tm, tk); w_ref: (tn, tk) torch (Out, In) layout; b_ref: (1, tn);
    # o_ref: (tm, tn) f32 — resident across the K grid axis, used as the
    # accumulator directly (no scratch, no epilogue copy).
    k = pl.program_id(2)

    @pl.when(k == 0)
    def _():
        o_ref[...] = jnp.broadcast_to(
            b_ref[...].astype(o_ref.dtype), o_ref.shape
        )

    o_ref[...] += lax.dot_general(
        x_ref[...],
        w_ref[...],
        dimension_numbers=(((1,), (1,)), ((), ())),  # contract In with In
        preferred_element_type=jnp.float32,
    )


def _linear_kernel_acc(x_ref, w_ref, b_ref, o_ref, acc_ref):
    # Low-precision output path: f32 VMEM accumulator, cast + bias in epilogue.
    k = pl.program_id(2)

    @pl.when(k == 0)
    def _():
        acc_ref[...] = jnp.zeros_like(acc_ref)

    acc_ref[...] += lax.dot_general(
        x_ref[...],
        w_ref[...],
        dimension_numbers=(((1,), (1,)), ((), ())),
        preferred_element_type=jnp.float32,
    )

    @pl.when(k == pl.num_programs(2) - 1)
    def _():
        o_ref[...] = (
            acc_ref[...] + b_ref[...].astype(jnp.float32)
        ).astype(o_ref.dtype)


@functools.partial(jax.jit, static_argnames=("tm", "tn", "tk"))
def linear_pallas(x, weights, bias, *, tm=256, tn=512, tk=512):
    """Computes x @ weights.T + bias with a tiled Pallas TPU matmul."""
    B, In = x.shape
    Out, In2 = weights.shape
    assert In == In2, "weights must be (output_size, input_size)"

    out_dtype = jnp.result_type(x.dtype, weights.dtype)

    # Dtype-aware sublane alignment for the M (row) dimension.
    sub_m = max(_sublane_multiple(x.dtype), _sublane_multiple(out_dtype))

    tm, Mp = _pick_tile(B, tm, sub_m)   # rows of x / out
    tn, Np = _pick_tile(Out, tn, 128)   # rows of W == cols of out (lane dim)
    tk, Kp = _pick_tile(In, tk, 128)    # contraction (lane dim of x and W)

    # Pad only when a dimension is actually ragged w.r.t. its tile.  K must be
    # zero-padded on BOTH operands so the reduction stays exact.
    x_p = x
    if (Mp, Kp) != (B, In):
        x_p = jnp.pad(x, ((0, Mp - B), (0, Kp - In)))
    w_p = weights
    if (Np, Kp) != (Out, In):
        w_p = jnp.pad(weights, ((0, Np - Out), (0, Kp - In)))
    b_p = bias.reshape(1, Out)
    if Np != Out:
        b_p = jnp.pad(b_p, ((0, 0), (0, Np - Out)))

    grid = (Mp // tm, Np // tn, Kp // tk)

    # f32 output accumulates straight into the resident output block; only
    # lower-precision outputs need a separate f32 scratch accumulator.
    if out_dtype == jnp.float32:
        kernel = _linear_kernel_f32
        scratch_shapes = []
        acc_bytes = 0
    else:
        kernel = _linear_kernel_acc
        scratch_shapes = [pltpu.VMEM((tm, tn), jnp.float32)]
        acc_bytes = tm * tn * 4

    x_item = jnp.dtype(x_p.dtype).itemsize
    w_item = jnp.dtype(w_p.dtype).itemsize
    b_item = jnp.dtype(b_p.dtype).itemsize
    o_item = jnp.dtype(out_dtype).itemsize

    # Double-buffered per-tile VMEM footprint + 50% headroom, capped for v7x.
    tile_bytes = (
        2 * tm * tk * x_item
        + 2 * tn * tk * w_item
        + 2 * tm * tn * o_item
        + 2 * tn * b_item
        + acc_bytes
    )
    vmem_limit = int(min(64 * 1024 * 1024,
                         max(8 * 1024 * 1024, tile_bytes + tile_bytes // 2)))

    bytes_accessed = (
        x_p.size * x_item
        + w_p.size * w_item
        + b_p.size * b_item
        + Mp * Np * o_item
    )

    out_p = pl.pallas_call(
        kernel,
        out_shape=jax.ShapeDtypeStruct((Mp, Np), out_dtype),
        grid=grid,
        in_specs=[
            pl.BlockSpec((tm, tk), lambda i, j, k: (i, k)),  # x tile (M, K)
            pl.BlockSpec((tn, tk), lambda i, j, k: (j, k)),  # W tile (N, K)
            pl.BlockSpec((1, tn), lambda i, j, k: (0, j)),   # bias tile
        ],
        out_specs=pl.BlockSpec((tm, tn), lambda i, j, k: (i, j)),
        scratch_shapes=scratch_shapes,
        compiler_params=pltpu.CompilerParams(
            dimension_semantics=("parallel", "parallel", "arbitrary"),
            vmem_limit_bytes=vmem_limit,
        ),
        cost_estimate=pl.CostEstimate(
            flops=2 * Mp * Kp * Np,
            transcendentals=0,
            bytes_accessed=bytes_accessed,
        ),
    )(x_p, w_p, b_p)

    if (Mp, Np) != (B, Out):
        out_p = out_p[:B, :Out]
    return out_p


def init_layer_params(key, input_size, output_size, dtype=jnp.float32):
    # Matches Layer.init_params: uniform(-stdv, stdv), stdv = 1/sqrt(input_size)
    stdv = 1.0 / math.sqrt(input_size)
    kw, kb = jax.random.split(key)
    weights = jax.random.uniform(
        kw, (output_size, input_size), dtype=dtype, minval=-stdv, maxval=stdv
    )
    bias = jax.random.uniform(
        kb, (output_size,), dtype=dtype, minval=-stdv, maxval=stdv
    )
    return weights, bias


if __name__ == "__main__":
    key = jax.random.PRNGKey(0)
    k_in, k_param = jax.random.split(key)

    # Small shapes consistent with the module's forward.
    batch = 8
    input_size = 32
    output_size = 16

    x = jax.random.normal(k_in, (batch, input_size), dtype=jnp.float32)
    weights, bias = init_layer_params(k_param, input_size, output_size)

    out = jax.block_until_ready(linear_pallas(x, weights, bias))
    ref = x @ weights.T + bias
    assert out.shape == (batch, output_size)
    assert jnp.allclose(out, ref, atol=1e-5, rtol=1e-5)

    # Larger, multi-tile, ragged f32 shape (exercises the tiled / padded path
    # and the direct-to-output accumulator kernel).
    xb = jax.random.normal(jax.random.PRNGKey(1), (260, 384), dtype=jnp.float32)
    wb, bb = init_layer_params(jax.random.PRNGKey(2), 384, 300)
    outb = jax.block_until_ready(linear_pallas(xb, wb, bb))
    refb = xb @ wb.T + bb
    assert outb.shape == (260, 300)
    assert jnp.allclose(outb, refb, atol=1e-4, rtol=1e-4)

    # bf16 activations/weights (exercises the f32-scratch epilogue kernel and
    # the dtype-aware sublane rounding); accumulation stays in f32.
    xh = xb.astype(jnp.bfloat16)
    wh = wb.astype(jnp.bfloat16)
    bh = bb.astype(jnp.bfloat16)
    outh = jax.block_until_ready(linear_pallas(xh, wh, bh))
    refh = (xh.astype(jnp.float32) @ wh.astype(jnp.float32).T
            + bh.astype(jnp.float32))
    assert outh.dtype == jnp.bfloat16
    assert jnp.allclose(outh.astype(jnp.float32), refh, atol=5e-2, rtol=5e-2)

    print("KERNEL_OK")
</pallas_src>

<mosaic_0001>
module attributes {stable_mosaic.version = 11 : i64} {
  func.func @_linear_kernel_f32(%arg0: i32, %arg1: i32, %arg2: i32, %arg3: memref<8x32xf32, #tpu.memory_space<vmem>>, %arg4: memref<16x32xf32, #tpu.memory_space<vmem>>, %arg5: memref<1x16xf32, #tpu.memory_space<vmem>>, %arg6: memref<8x16xf32, #tpu.memory_space<vmem>>) attributes {dimension_semantics = [#tpu.dimension_semantics<parallel>, #tpu.dimension_semantics<parallel>, #tpu.dimension_semantics<arbitrary>], iteration_bounds = array<i64: 1, 1, 1>, scalar_prefetch = 0 : i64, scratch_operands = 0 : i64, tpu.core_type = #tpu.core_type<tc>, window_params = [{transform_indices = @transform_0, window_bounds = array<i64: 8, 32>}, {transform_indices = @transform_1, window_bounds = array<i64: 16, 32>}, {transform_indices = @transform_2, window_bounds = array<i64: 1, 16>}, {transform_indices = @transform_3, window_bounds = array<i64: 8, 16>}]} {
    %c0_i32 = arith.constant 0 : i32
    %0 = arith.cmpi eq, %arg2, %c0_i32 : i32
    %1 = arith.extui %0 : i1 to i32
    %c0_i32_0 = arith.constant 0 : i32
    %2 = arith.cmpi ne, %1, %c0_i32_0 : i32
    scf.if %2 {
      %c0_8 = arith.constant 0 : index
      %c0_9 = arith.constant 0 : index
      %9 = vector.load %arg5[%c0_8, %c0_9] : memref<1x16xf32, #tpu.memory_space<vmem>>, vector<1x16xf32>
      %10 = vector.shape_cast %9 : vector<1x16xf32> to vector<1x16xf32>
      %11 = vector.broadcast %10 : vector<1x16xf32> to vector<8x16xf32>
      %c0_10 = arith.constant 0 : index
      %c0_11 = arith.constant 0 : index
      %12 = vector.load %arg6[%c0_10, %c0_11] : memref<8x16xf32, #tpu.memory_space<vmem>>, vector<8x16xf32>
      tpu.vector_store %arg6[%c0_10, %c0_11], %11 {strides = array<i32>} : memref<8x16xf32, #tpu.memory_space<vmem>>, vector<8x16xf32>,
    } else {
    }
    %c0 = arith.constant 0 : index
    %c0_1 = arith.constant 0 : index
    %3 = vector.load %arg6[%c0, %c0_1] : memref<8x16xf32, #tpu.memory_space<vmem>>, vector<8x16xf32>
    %c0_2 = arith.constant 0 : index
    %c0_3 = arith.constant 0 : index
    %4 = vector.load %arg3[%c0_2, %c0_3] : memref<8x32xf32, #tpu.memory_space<vmem>>, vector<8x32xf32>
    %c0_4 = arith.constant 0 : index
    %c0_5 = arith.constant 0 : index
    %5 = vector.load %arg4[%c0_4, %c0_5] : memref<16x32xf32, #tpu.memory_space<vmem>>, vector<16x32xf32>
    %cst = arith.constant dense<0.000000e+00> : vector<8x16xf32>
    %6 = tpu.matmul %4, %5, %cst {dimension_numbers = #tpu.dot_dimension_numbers<[1], [1], [0], [0], [0, 0, 1, 0], [], []>} : vector<8x32xf32>, vector<16x32xf32>, vector<8x16xf32> -> vector<8x16xf32>
    %7 = arith.addf %3, %6 : vector<8x16xf32>
    %c0_6 = arith.constant 0 : index
    %c0_7 = arith.constant 0 : index
    %8 = vector.load %arg6[%c0_6, %c0_7] : memref<8x16xf32, #tpu.memory_space<vmem>>, vector<8x16xf32>
    tpu.vector_store %arg6[%c0_6, %c0_7], %7 {strides = array<i32>} : memref<8x16xf32, #tpu.memory_space<vmem>>, vector<8x16xf32>,
    return
  }
  func.func @transform_0(%arg0: i32, %arg1: i32, %arg2: i32) -> (i32, i32) {
    %c0_i32 = arith.constant 0 : i32
    return %arg0, %arg2 : i32, i32
  }
  func.func @transform_1(%arg0: i32, %arg1: i32, %arg2: i32) -> (i32, i32) {
    %c0_i32 = arith.constant 0 : i32
    return %arg1, %arg2 : i32, i32
  }
  func.func @transform_2(%arg0: i32, %arg1: i32, %arg2: i32) -> (i32, i32) {
    %c0_i32 = arith.constant 0 : i32
    %c0_i32_0 = arith.constant 0 : i32
    return %c0_i32, %arg1 : i32, i32
  }
  func.func @transform_3(%arg0: i32, %arg1: i32, %arg2: i32) -> (i32, i32) {
    %c0_i32 = arith.constant 0 : i32
    return %arg0, %arg1 : i32, i32
  }
}

</mosaic_0001>

<bundles_post_ra>
// kernel: linear_pallas.1
= control target key start
LH: loop header
LB: loop body
LE: loop exit
PB: predicated region body
PF: predicated region fallthrough
CT: control target
= control target key end

     0   :  { %8 = vsyncpa [#allocation3], 0  ;;  %s331_s0 = inlined_call_operand.hbm [shape: f32[8,32], index: 0, kind: input, shape index: {}]   ;;  %s332_s1 = inlined_call_operand.hbm [shape: f32[16,32], index: 1, kind: input, shape index: {}]   ;;  %s333_s2 = inlined_call_operand.vmem [shape: f32[1,16], index: 2, kind: input, shape index: {}]   ;;  %s334_s3 = inlined_call_operand.hbm [shape: f32[8,16], index: 3, kind: output, shape index: {}]  }
   0x1   :  { %9 = vsyncpa [#allocation6], 0 }
   0x2   :  { %10 = vsyncpa [#allocation4], 0  ;;  %s255_s12 = smov [#allocation2]   ;;  %s256_s14 = smov [#allocation5]  }
   0x3   :  { %s17_s13 = sshll.u32 %s255_s12, 4  ;;  %s26_s15 = sshll.u32 %s256_s14, 4  ;;  %s18_s13 = int_to_ptr.vmem [resolvable:$true] %s17_s13  ;;  %s283_s15 = int_to_ptr.vmem [resolvable:$true] %s26_s15 }
   0x4   :  { %s183_s18 = scalar_lea.hbm %s331_s0, 128 }
   0x5   :  { %p184_p0 = scmp.ne.s32.totalorder %s331_s0, %s183_s18  ;;  %p187_p1 = scmp.lt.u32.totalorder %s183_s18, %s331_s0 }
   0x7   :  { %p189_p2 = pnand %p187_p1, %p184_p0 }
   0x9   :  { %192 = shalt.err (!%p189_p2)
}
   0xa   :  { %s193_s23 = scalar_lea.vmem %s18_s13, 128  ;;  %p198_p4 = scmp.lt.s32.totalorder %s18_s13, %s18_s13 }
   0xb   :  { %p194_p3 = scmp.ne.s32.totalorder %s18_s13, %s193_s23  ;;  %p199_p5 = scmp.lt.s32.totalorder %s193_s23, %s193_s23 }
   0xd   :  { %p200_p6 = por %p199_p5, %p198_p4 }
   0xf   :  { %p201_p7 = pnand %p200_p6, %p194_p3 }
  0x11   :  { %204 = shalt.err (!%p201_p7)
}
  0x12   :  { %20 = dma.hbm_to_vmem [thread:$0]  %s331_s0, 128, %s18_s13, [#allocation3]  }
  0x13   :  { %s205_s28 = scalar_lea.hbm %s332_s1, 256 }
  0x14   :  { %p206_p8 = scmp.ne.s32.totalorder %s332_s1, %s205_s28  ;;  %p209_p9 = scmp.lt.u32.totalorder %s205_s28, %s332_s1 }
  0x16   :  { %p211_p10 = pnand %p209_p9, %p206_p8 }
  0x18   :  { %214 = shalt.err (!%p211_p10)
}
  0x19   :  { %s215_s6 = scalar_lea.vmem %s283_s15, 256  ;;  %p220_p12 = scmp.lt.s32.totalorder %s283_s15, %s283_s15 }
  0x1a   :  { %p216_p11 = scmp.ne.s32.totalorder %s283_s15, %s215_s6  ;;  %p221_p13 = scmp.lt.s32.totalorder %s215_s6, %s215_s6 }
  0x1c   :  { %p222_p0 = por %p221_p13, %p220_p12 }
  0x1e   :  { %p223_p1 = pnand %p222_p0, %p216_p11 }
  0x20   :  { %226 = shalt.err (!%p223_p1)
}
  0x21   :  { %s257_s0 = smov 128   ;;  %s258_s7 = smov 8  }
  0x22   :  { %32 = dma.hbm_to_vmem [thread:$0]  %s332_s1, 256, %s283_s15, [#allocation6], %s257_s0, %s257_s0, %s258_s7  }
  0x23   :  { %249 = dma.done.wait [#allocation3], 128  }
  0x24   :  { %250 = vsyncadd [#allocation3], 4294967168 }
  0x25   :  { %251 = dma.done.wait [#allocation6], 256  }
  0x26   :  { %252 = vsyncadd [#allocation6], 4294967040  ;;  %v259_v0 = vmov 0.0|0.0   ;;  %vm260_vm0 = vmmov 0   ;;  %v261_v1 = vmov 0.0   ;;  %vm58_vm1 = vcmask 261120  }
  0x27   :  { %171 = vmatprep.subr.bf16.mxu0 %v259_v0  ;;  %168 = vmatprep.mubr.msk.f32.mxu0 %vm260_vm0, %v261_v1  ;;  %vm52_vm2 = vcmask 130048   ;;  %vm173_vm3 = vmpackc.low %vm58_vm1, %vm58_vm1  ;;  %v157_v2 = vld [vmem:[%s333_s2] ss:$0 sm:$0xff]  ;;  %v56_v3 = vld [vmem:[#allocation5] sm:$0xff]  ;;  %s262_s1 = smov [#allocation7]  }
  0x28   :  { %v57_v4 = vld [vmem:[#allocation5 + $0x8] sm:$0xff]  ;;  %53 = vst.msk [vmem:[#allocation7] sm:$0xff] %vm52_vm2, %v157_v2  ;;  %v55_v6 = vld [vmem:[#allocation2] sm:$0xff]  ;;  %s147_s12 = sshll.u32 %s262_s1, 4  ;;  %s148_s12 = int_to_ptr.vmem [resolvable:$true] %s147_s12 }
  0x29   :  { %v172_v5 = vpack.c.bf16 %v57_v4, %v56_v3  ;;  %s227_s13 = scalar_lea.vmem %s148_s12, 128  ;;  %p232_p3 = scmp.lt.s32.totalorder %s148_s12, %s148_s12 }
  0x2a   :  { %p228_p2 = scmp.ne.s32.totalorder %s148_s12, %s227_s13  ;;  %p233_p4 = scmp.lt.s32.totalorder %s227_s13, %s227_s13 }
  0x2b   :  { %174 = vmatpush3.bf16.xpose.msk.msra.mxu0 %vm173_vm3, %v172_v5 }
  0x2c   :  { %p234_p5 = por %p233_p4, %p232_p3 }
  0x2e   :  { %p235_p6 = pnand %p234_p5, %p228_p2 }
  0x2f   :  { %v54_v7 = vld [vmem:[#allocation7] sm:$0xff] }
  0x32   :  { %169 = vmatmul.mubr.msk.f32.vlgmr.msra.gmra.mrb[0].mxu0 %vm58_vm1, %v55_v6 }
 0x105   :  { %v134_v8 = vpop.f32.mrb[0].mxu0 }
 0x106   :  { %v138_v9 = vadd.f32 %v134_v8, %v54_v7  ;;  %v170_v10 = vpop.f32.mrb[1].mxu0 }
 0x108   :  { %140 = vst.msk [vmem:[#allocation7] sm:$0xff] %vm52_vm2, %v138_v9 }
 0x109   :  { %238 = shalt.err (!%p235_p6)
}
 0x10a   :  { %s239_s15 = scalar_lea.hbm %s334_s3, 128 }
 0x10b   :  { %p240_p7 = scmp.ne.s32.totalorder %s334_s3, %s239_s15  ;;  %p243_p8 = scmp.lt.u32.totalorder %s239_s15, %s334_s3 }
 0x10d   :  { %p245_p9 = pnand %p243_p8, %p240_p7 }
 0x10f   :  { %248 = shalt.err (!%p245_p9)
}
 0x110   :  { %150 = dma.vmem_to_hbm [thread:$0]  %s148_s12, 128, %s334_s3, [#allocation4]  }
 0x111   :  { %253 = dma.done.wait [#allocation4], 128  }
 0x112   :  { %254 = vsyncadd [#allocation4], 4294967168 }
 0x113   :  { %154 = vsyncpa [#allocation3], 1 }
 0x114   :  { %155 = vsyncpa [#allocation6], 1 }
 0x115   :  { %156 = vsyncpa [#allocation4], 1 }

</bundles_post_ra>
